<compile_context>
chip_gen: v5e
topology: v5e:2x2
jax: 0.10.0
libtpu: 0.0.40
codegen_flags: <defaults>
</compile_context>

<pallas_src>
import jax
import jax.numpy as jnp
from jax import lax
from jax.experimental import pallas as pl
from jax.experimental.pallas import tpu as pltpu

# Small, module-consistent sizes.
N, NI, NF, L = 2, 4, 8, 64          # batch, in-channels, filters, sequence length
KS = [39, 19, 9]                    # ks=40 -> [40, 20, 10] -> odd -> [39, 19, 9]
K39 = KS[0]
PMAX = (K39 - 1) // 2               # 19 : "same" padding of the widest branch
NL = N * L                          # 128 : lane axis inside the kernel
C_OUT = 4 * NF                      # 32
KC = NI * K39 + NI                  # 160 : fused contraction rows (39 taps + maxpool) * NI
XROWS = 2 * NI                      # 8  : full f32 sublane tile; two taps per 8-row group
NUM_GROUPS = KC // XROWS            # 20 : tap-pair groups (last = tap 38 + maxpool)
NUM_SLABS = NUM_GROUPS // 2         # 10 : (16,128) bf16 stores into the im2col scratch
EPS = 1e-5


def inception_kernel(xd_ref, wall_ref, gamma_ref, beta_ref, out_ref, a_ref):
    xd = xd_ref[...]                                   # (8, 128) f32; rows NI.. are zero pad

    row = lax.broadcasted_iota(jnp.int32, (XROWS, NL), 0)
    lane = lax.broadcasted_iota(jnp.int32, (XROWS, NL), 1)
    is_top = row < NI                                  # top half of each 8-row tap-pair group
    l_idx = lane % L                                   # position within one sequence
    base_l = l_idx - PMAX + jnp.where(is_top, 0, 1)    # bottom half carries tap t+1

    # Circular lane windows: d[:, s:s+NL][c, j] == v[c, (j + s) % NL].  Static
    # full-width slices lower to XLU lane rotates; all operands stay full tiles.
    dxd = jnp.concatenate([xd, xd], axis=-1)           # (8, 256)
    xd_l1 = dxd[:, 1:1 + NL]                           # value at lane j+1 (circular)

    # x8: rows 0..NI-1 = X, rows NI..2NI-1 = X shifted one lane, so one shifted
    # copy of x8 yields two adjacent im2col taps at once.
    x8 = jnp.where(is_top, xd, pltpu.roll(xd_l1, NI, axis=0))   # half-size sublane roll
    dx8 = jnp.concatenate([x8, x8], axis=-1)           # (8, 256)

    # MaxPool1d(3, stride 1, pad 1) of the raw input as one full-width op.
    left = jnp.where(l_idx == 0, xd, dxd[:, NL - 1:2 * NL - 1])   # x[.., l-1], edge-clamped
    right = jnp.where(l_idx == L - 1, xd, xd_l1)                  # x[.., l+1], edge-clamped
    mp = jnp.maximum(jnp.maximum(xd, left), right)
    mp_bot = pltpu.roll(mp, NI, axis=0)                # maxpool rows moved to the bottom half

    # im2col: A[NI*t + c, n*L + l] = x_zeropad[n, c, l + t - PMAX]; rows 156+c = maxpool.
    def pair_block(g):                                 # (8,128) f32 block = taps (2g, 2g+1)
        t = 2 * g
        s0 = (t - PMAX) % NL
        shifted = dx8[:, s0:s0 + NL]
        if g < NUM_GROUPS - 1:
            lt = base_l + t
            return jnp.where((lt >= 0) & (lt < L), shifted, 0.0)
        # Last group: rows 0..NI-1 = tap 38, rows NI.. = maxpool branch.
        lt = l_idx + (t - PMAX)
        top = jnp.where((lt >= 0) & (lt < L), shifted, 0.0)
        return jnp.where(is_top, top, mp_bot)

    # Two tap-pair groups -> one (16,128) bf16 tile -> one unmasked full-width store.
    for s in range(NUM_SLABS):
        slab = jnp.concatenate([pair_block(2 * s), pair_block(2 * s + 1)], axis=0)
        a_ref[16 * s:16 * (s + 1), :] = slab.astype(jnp.bfloat16)

    # One fused MXU matmul for all four branches (bottleneck folded offline).
    y = jnp.dot(wall_ref[...], a_ref[...], preferred_element_type=jnp.float32)  # (32, 128)

    # BatchNorm1d (training: batch mean, biased var; centered two-pass) + ReLU.
    # TODO(synk): BN running-mean/var (momentum) buffer updates are a training-time
    # side effect of nn.BatchNorm1d and are not materialized here.
    inv_n = 1.0 / float(NL)
    mean = jnp.sum(y, axis=1, keepdims=True) * inv_n
    yc = y - mean
    var = jnp.sum(yc * yc, axis=1, keepdims=True) * inv_n
    scale = gamma_ref[...] * lax.rsqrt(var + EPS)
    out_ref[...] = jnp.maximum(yc * scale + beta_ref[...], 0.0)   # lane-dense (32,128) store


def _full_spec(shape):
    nd = len(shape)
    return pl.BlockSpec(shape, lambda i, _nd=nd: (0,) * _nd)


def pack_params(wb_oik, w39_oik, w19_oik, w9_oik, wmp_oik, gamma, beta):
    """Fold the 1x1 bottleneck into the branch conv weights (f32) and column-stack
    everything into one (C_OUT, KC) matrix matching the kernel's im2col row layout
    (row = NI*t + c for taps t of the widest kernel; rows NI*K39 + c = maxpool)."""
    wb = wb_oik[:, :, 0].astype(jnp.float32)                       # (NF, NI)
    w_all = jnp.zeros((C_OUT, KC), jnp.float32)

    def put(wa, w_oct, row0, tap_off):
        o, ci, k = w_oct.shape                                     # (NF, NI, k)
        blk = jnp.transpose(w_oct, (0, 2, 1)).reshape(o, k * ci)   # col = tk*NI + c
        return wa.at[row0:row0 + o, NI * tap_off:NI * tap_off + k * ci].set(blk)

    for b, (w, k) in enumerate(zip((w39_oik, w19_oik, w9_oik), KS)):
        wf = jnp.einsum('oft,fc->oct', w.astype(jnp.float32), wb)  # fold bottleneck (f32)
        w_all = put(w_all, wf, b * NF, PMAX - (k - 1) // 2)        # tap offsets 0 / 10 / 15
    w_all = w_all.at[3 * NF:, NI * K39:NI * K39 + NI].set(
        wmp_oik[:, :, 0].astype(jnp.float32))                      # maxpool 1x1 conv

    return (w_all.astype(jnp.bfloat16),
            gamma.reshape(C_OUT, 1).astype(jnp.float32),
            beta.reshape(C_OUT, 1).astype(jnp.float32))


def inception_forward(x_ncl, packed):
    """x_ncl: (N, NI, L) float32 (PyTorch NCL); returns (N, 4*NF, L)."""
    w_all, gamma, beta = packed
    # Pure layout plumbing: X[c, n*L + l] = x[n, c, l], padded to a full 8-row tile.
    xt = jnp.transpose(x_ncl.astype(jnp.float32), (1, 0, 2)).reshape(NI, NL)
    xd = jnp.pad(xt, ((0, XROWS - NI), (0, 0)))
    args = (xd, w_all, gamma, beta)
    y_t = pl.pallas_call(
        inception_kernel,
        grid=(1,),
        in_specs=[_full_spec(a.shape) for a in args],
        out_specs=_full_spec((C_OUT, NL)),
        out_shape=jax.ShapeDtypeStruct((C_OUT, NL), jnp.float32),
        scratch_shapes=[pltpu.VMEM((KC, NL), jnp.bfloat16)],   # im2col A, built in bf16
    )(*args)
    # (C_OUT, N*L) -> PyTorch NCL (N, C_OUT, L); negligible at this size.
    return jnp.transpose(y_t.reshape(C_OUT, N, L), (1, 0, 2))


# ---------------- pure-JAX reference (for a sanity check) ----------------
def reference_forward(x, wb_oik, ws_oik, wmp_oik, gamma, beta):
    dn = ("NCH", "OIH", "NCH")
    b = lax.conv_general_dilated(x, wb_oik, (1,), "VALID", dimension_numbers=dn)
    outs = []
    for w in ws_oik:
        k = w.shape[-1]
        p = (k - 1) // 2
        outs.append(lax.conv_general_dilated(b, w, (1,), [(p, p)],
                                             dimension_numbers=dn))
    mp = lax.reduce_window(x, -jnp.inf, lax.max, (1, 1, 3), (1, 1, 1),
                           ((0, 0), (0, 0), (1, 1)))
    outs.append(lax.conv_general_dilated(mp, wmp_oik, (1,), "VALID",
                                         dimension_numbers=dn))
    y = jnp.concatenate(outs, axis=1)                                # (N, 4NF, L)
    mean = jnp.mean(y, axis=(0, 2), keepdims=True)
    var = jnp.mean((y - mean) ** 2, axis=(0, 2), keepdims=True)
    y_hat = (y - mean) / jnp.sqrt(var + EPS)
    return jnp.maximum(y_hat * gamma.reshape(1, -1, 1) + beta.reshape(1, -1, 1), 0.0)


if __name__ == "__main__":
    key = jax.random.PRNGKey(0)
    ks = jax.random.split(key, 8)

    # Deterministic parameter init, shapes follow the module's __init__
    wb_oik = 0.3 * jax.random.normal(ks[0], (NF, NI, 1), jnp.float32)     # bottleneck
    w39_oik = 0.1 * jax.random.normal(ks[1], (NF, NF, 39), jnp.float32)
    w19_oik = 0.1 * jax.random.normal(ks[2], (NF, NF, 19), jnp.float32)
    w9_oik = 0.1 * jax.random.normal(ks[3], (NF, NF, 9), jnp.float32)
    wmp_oik = 0.3 * jax.random.normal(ks[4], (NF, NI, 1), jnp.float32)    # after maxpool
    gamma = 1.0 + 0.1 * jax.random.normal(ks[5], (C_OUT,), jnp.float32)   # BN weight
    beta = 0.1 * jax.random.normal(ks[6], (C_OUT,), jnp.float32)          # BN bias
    x = jax.random.normal(ks[7], (N, NI, L), jnp.float32)                 # NCL input

    packed = pack_params(wb_oik, w39_oik, w19_oik, w9_oik, wmp_oik, gamma, beta)

    out = inception_forward(x, packed)
    jax.block_until_ready(out)
    assert out.shape == (N, C_OUT, L) and out.dtype == jnp.float32

    ref = reference_forward(x, wb_oik, [w39_oik, w19_oik, w9_oik],
                            wmp_oik, gamma, beta)
    assert jnp.allclose(out, ref, atol=5e-2, rtol=5e-2), \
        f"max abs diff {jnp.max(jnp.abs(out - ref))}"

    print("KERNEL_OK")
</pallas_src>

<mosaic_0001>
module attributes {stable_mosaic.version = 11 : i64} {
  func.func @inception_kernel(%arg0: i32, %arg1: memref<8x128xf32, #tpu.memory_space<vmem>>, %arg2: memref<32x160xbf16, #tpu.memory_space<vmem>>, %arg3: memref<32x1xf32, #tpu.memory_space<vmem>>, %arg4: memref<32x1xf32, #tpu.memory_space<vmem>>, %arg5: memref<32x128xf32, #tpu.memory_space<vmem>>, %arg6: memref<160x128xbf16, #tpu.memory_space<vmem>>) attributes {dimension_semantics = [#tpu.dimension_semantics<arbitrary>], iteration_bounds = array<i64: 1>, scalar_prefetch = 0 : i64, scratch_operands = 1 : i64, tpu.core_type = #tpu.core_type<tc>, window_params = [{pipeline_mode = #tpu.pipeline_mode<synchronous>, transform_indices = @transform_0, window_bounds = array<i64: 8, 128>}, {pipeline_mode = #tpu.pipeline_mode<synchronous>, transform_indices = @transform_1, window_bounds = array<i64: 32, 160>}, {pipeline_mode = #tpu.pipeline_mode<synchronous>, transform_indices = @transform_2, window_bounds = array<i64: 32, 1>}, {pipeline_mode = #tpu.pipeline_mode<synchronous>, transform_indices = @transform_3, window_bounds = array<i64: 32, 1>}, {pipeline_mode = #tpu.pipeline_mode<synchronous>, transform_indices = @transform_4, window_bounds = array<i64: 32, 128>}]} {
    %c0 = arith.constant 0 : index
    %c0_0 = arith.constant 0 : index
    %0 = vector.load %arg1[%c0, %c0_0] : memref<8x128xf32, #tpu.memory_space<vmem>>, vector<8x128xf32>
    %1 = tpu.iota {dimensions = array<i32: 0>} : vector<8x128xi32>
    %2 = tpu.iota {dimensions = array<i32: 1>} : vector<8x128xi32>
    %c4_i32 = arith.constant 4 : i32
    %3 = vector.broadcast %c4_i32 : i32 to vector<8x128xi32>
    %4 = arith.cmpi slt, %1, %3 : vector<8x128xi32>
    %c64_i32 = arith.constant 64 : i32
    %c0_i32 = arith.constant 0 : i32
    %5 = arith.cmpi eq, %c64_i32, %c0_i32 : i32
    %c1_i32 = arith.constant 1 : i32
    %6 = arith.select %5, %c1_i32, %c64_i32 : i32
    %7 = vector.broadcast %6 : i32 to vector<8x128xi32>
    %8 = arith.remsi %2, %7 : vector<8x128xi32>
    %c0_i32_1 = arith.constant 0 : i32
    %9 = vector.broadcast %c0_i32_1 : i32 to vector<8x128xi32>
    %10 = arith.cmpi ne, %8, %9 : vector<8x128xi32>
    %c0_i32_2 = arith.constant 0 : i32
    %11 = vector.broadcast %c0_i32_2 : i32 to vector<8x128xi32>
    %12 = arith.cmpi slt, %8, %11 : vector<8x128xi32>
    %c0_i32_3 = arith.constant 0 : i32
    %13 = arith.cmpi slt, %6, %c0_i32_3 : i32
    %14 = vector.broadcast %13 : i1 to vector<8x128xi1>
    %15 = vector.broadcast %14 : vector<8x128xi1> to vector<8x128xi1>
    %16 = arith.xori %12, %15 : vector<8x128xi1>
    %17 = arith.andi %16, %10 : vector<8x128xi1>
    %18 = vector.broadcast %6 : i32 to vector<8x128xi32>
    %19 = arith.addi %8, %18 : vector<8x128xi32>
    %20 = arith.select %17, %19, %8 : vector<8x128xi1>, vector<8x128xi32>
    %c19_i32 = arith.constant 19 : i32
    %21 = vector.broadcast %c19_i32 : i32 to vector<8x128xi32>
    %22 = arith.subi %20, %21 : vector<8x128xi32>
    %c0_i32_4 = arith.constant 0 : i32
    %c1_i32_5 = arith.constant 1 : i32
    %23 = vector.broadcast %c0_i32_4 : i32 to vector<8x128xi32>
    %24 = vector.broadcast %c1_i32_5 : i32 to vector<8x128xi32>
    %25 = arith.select %4, %23, %24 : vector<8x128xi1>, vector<8x128xi32>
    %26 = arith.addi %22, %25 : vector<8x128xi32>
    %27 = tpu.concatenate %0, %0 in 1 : vector<8x128xf32>, vector<8x128xf32> -> vector<8x256xf32>
    %28 = vector.extract_strided_slice %27 {offsets = [0, 1], sizes = [8, 128], strides = [1, 1]} : vector<8x256xf32> to vector<8x128xf32>
    %c4_i32_6 = arith.constant 4 : i32
    %29 = tpu.dynamic_rotate %28 by %c4_i32_6 dim 0 : vector<8x128xf32>, i32 -> vector<8x128xf32>
    %30 = arith.select %4, %0, %29 : vector<8x128xi1>, vector<8x128xf32>
    %31 = tpu.concatenate %30, %30 in 1 : vector<8x128xf32>, vector<8x128xf32> -> vector<8x256xf32>
    %c0_i32_7 = arith.constant 0 : i32
    %32 = vector.broadcast %c0_i32_7 : i32 to vector<8x128xi32>
    %33 = arith.cmpi eq, %20, %32 : vector<8x128xi32>
    %34 = vector.extract_strided_slice %27 {offsets = [0, 127], sizes = [8, 128], strides = [1, 1]} : vector<8x256xf32> to vector<8x128xf32>
    %35 = arith.select %33, %0, %34 : vector<8x128xi1>, vector<8x128xf32>
    %c63_i32 = arith.constant 63 : i32
    %36 = vector.broadcast %c63_i32 : i32 to vector<8x128xi32>
    %37 = arith.cmpi eq, %20, %36 : vector<8x128xi32>
    %38 = arith.select %37, %0, %28 : vector<8x128xi1>, vector<8x128xf32>
    %39 = arith.maximumf %0, %35 : vector<8x128xf32>
    %40 = arith.maximumf %39, %38 : vector<8x128xf32>
    %c4_i32_8 = arith.constant 4 : i32
    %41 = tpu.dynamic_rotate %40 by %c4_i32_8 dim 0 : vector<8x128xf32>, i32 -> vector<8x128xf32>
    %42 = vector.extract_strided_slice %31 {offsets = [0, 109], sizes = [8, 128], strides = [1, 1]} : vector<8x256xf32> to vector<8x128xf32>
    %c0_i32_9 = arith.constant 0 : i32
    %43 = vector.broadcast %c0_i32_9 : i32 to vector<8x128xi32>
    %44 = arith.addi %26, %43 : vector<8x128xi32>
    %c0_i32_10 = arith.constant 0 : i32
    %45 = vector.broadcast %c0_i32_10 : i32 to vector<8x128xi32>
    %46 = arith.cmpi sge, %44, %45 : vector<8x128xi32>
    %c64_i32_11 = arith.constant 64 : i32
    %47 = vector.broadcast %c64_i32_11 : i32 to vector<8x128xi32>
    %48 = arith.cmpi slt, %44, %47 : vector<8x128xi32>
    %49 = arith.andi %46, %48 : vector<8x128xi1>
    %cst = arith.constant 0.000000e+00 : f32
    %50 = vector.broadcast %cst : f32 to vector<8x128xf32>
    %51 = arith.select %49, %42, %50 : vector<8x128xi1>, vector<8x128xf32>
    %52 = vector.extract_strided_slice %31 {offsets = [0, 111], sizes = [8, 128], strides = [1, 1]} : vector<8x256xf32> to vector<8x128xf32>
    %c2_i32 = arith.constant 2 : i32
    %53 = vector.broadcast %c2_i32 : i32 to vector<8x128xi32>
    %54 = arith.addi %26, %53 : vector<8x128xi32>
    %c0_i32_12 = arith.constant 0 : i32
    %55 = vector.broadcast %c0_i32_12 : i32 to vector<8x128xi32>
    %56 = arith.cmpi sge, %54, %55 : vector<8x128xi32>
    %c64_i32_13 = arith.constant 64 : i32
    %57 = vector.broadcast %c64_i32_13 : i32 to vector<8x128xi32>
    %58 = arith.cmpi slt, %54, %57 : vector<8x128xi32>
    %59 = arith.andi %56, %58 : vector<8x128xi1>
    %cst_14 = arith.constant 0.000000e+00 : f32
    %60 = vector.broadcast %cst_14 : f32 to vector<8x128xf32>
    %61 = arith.select %59, %52, %60 : vector<8x128xi1>, vector<8x128xf32>
    %62 = tpu.concatenate %51, %61 in 0 : vector<8x128xf32>, vector<8x128xf32> -> vector<16x128xf32>
    %63 = arith.truncf %62 : vector<16x128xf32> to vector<16x128xbf16>
    %c0_15 = arith.constant 0 : index
    %c0_16 = arith.constant 0 : index
    %64 = vector.load %arg6[%c0_15, %c0_16] : memref<160x128xbf16, #tpu.memory_space<vmem>>, vector<16x128xbf16>
    tpu.vector_store %arg6[%c0_15, %c0_16], %63 {strides = array<i32>} : memref<160x128xbf16, #tpu.memory_space<vmem>>, vector<16x128xbf16>,
    %65 = vector.extract_strided_slice %31 {offsets = [0, 113], sizes = [8, 128], strides = [1, 1]} : vector<8x256xf32> to vector<8x128xf32>
    %c4_i32_17 = arith.constant 4 : i32
    %66 = vector.broadcast %c4_i32_17 : i32 to vector<8x128xi32>
    %67 = arith.addi %26, %66 : vector<8x128xi32>
    %c0_i32_18 = arith.constant 0 : i32
    %68 = vector.broadcast %c0_i32_18 : i32 to vector<8x128xi32>
    %69 = arith.cmpi sge, %67, %68 : vector<8x128xi32>
    %c64_i32_19 = arith.constant 64 : i32
    %70 = vector.broadcast %c64_i32_19 : i32 to vector<8x128xi32>
    %71 = arith.cmpi slt, %67, %70 : vector<8x128xi32>
    %72 = arith.andi %69, %71 : vector<8x128xi1>
    %cst_20 = arith.constant 0.000000e+00 : f32
    %73 = vector.broadcast %cst_20 : f32 to vector<8x128xf32>
    %74 = arith.select %72, %65, %73 : vector<8x128xi1>, vector<8x128xf32>
    %75 = vector.extract_strided_slice %31 {offsets = [0, 115], sizes = [8, 128], strides = [1, 1]} : vector<8x256xf32> to vector<8x128xf32>
    %c6_i32 = arith.constant 6 : i32
    %76 = vector.broadcast %c6_i32 : i32 to vector<8x128xi32>
    %77 = arith.addi %26, %76 : vector<8x128xi32>
    %c0_i32_21 = arith.constant 0 : i32
    %78 = vector.broadcast %c0_i32_21 : i32 to vector<8x128xi32>
    %79 = arith.cmpi sge, %77, %78 : vector<8x128xi32>
    %c64_i32_22 = arith.constant 64 : i32
    %80 = vector.broadcast %c64_i32_22 : i32 to vector<8x128xi32>
    %81 = arith.cmpi slt, %77, %80 : vector<8x128xi32>
    %82 = arith.andi %79, %81 : vector<8x128xi1>
    %cst_23 = arith.constant 0.000000e+00 : f32
    %83 = vector.broadcast %cst_23 : f32 to vector<8x128xf32>
    %84 = arith.select %82, %75, %83 : vector<8x128xi1>, vector<8x128xf32>
    %85 = tpu.concatenate %74, %84 in 0 : vector<8x128xf32>, vector<8x128xf32> -> vector<16x128xf32>
    %86 = arith.truncf %85 : vector<16x128xf32> to vector<16x128xbf16>
    %c16 = arith.constant 16 : index
    %c0_24 = arith.constant 0 : index
    %87 = vector.load %arg6[%c16, %c0_24] : memref<160x128xbf16, #tpu.memory_space<vmem>>, vector<16x128xbf16>
    tpu.vector_store %arg6[%c16, %c0_24], %86 {strides = array<i32>} : memref<160x128xbf16, #tpu.memory_space<vmem>>, vector<16x128xbf16>,
    %88 = vector.extract_strided_slice %31 {offsets = [0, 117], sizes = [8, 128], strides = [1, 1]} : vector<8x256xf32> to vector<8x128xf32>
    %c8_i32 = arith.constant 8 : i32
    %89 = vector.broadcast %c8_i32 : i32 to vector<8x128xi32>
    %90 = arith.addi %26, %89 : vector<8x128xi32>
    %c0_i32_25 = arith.constant 0 : i32
    %91 = vector.broadcast %c0_i32_25 : i32 to vector<8x128xi32>
    %92 = arith.cmpi sge, %90, %91 : vector<8x128xi32>
    %c64_i32_26 = arith.constant 64 : i32
    %93 = vector.broadcast %c64_i32_26 : i32 to vector<8x128xi32>
    %94 = arith.cmpi slt, %90, %93 : vector<8x128xi32>
    %95 = arith.andi %92, %94 : vector<8x128xi1>
    %cst_27 = arith.constant 0.000000e+00 : f32
    %96 = vector.broadcast %cst_27 : f32 to vector<8x128xf32>
    %97 = arith.select %95, %88, %96 : vector<8x128xi1>, vector<8x128xf32>
    %98 = vector.extract_strided_slice %31 {offsets = [0, 119], sizes = [8, 128], strides = [1, 1]} : vector<8x256xf32> to vector<8x128xf32>
    %c10_i32 = arith.constant 10 : i32
    %99 = vector.broadcast %c10_i32 : i32 to vector<8x128xi32>
    %100 = arith.addi %26, %99 : vector<8x128xi32>
    %c0_i32_28 = arith.constant 0 : i32
    %101 = vector.broadcast %c0_i32_28 : i32 to vector<8x128xi32>
    %102 = arith.cmpi sge, %100, %101 : vector<8x128xi32>
    %c64_i32_29 = arith.constant 64 : i32
    %103 = vector.broadcast %c64_i32_29 : i32 to vector<8x128xi32>
    %104 = arith.cmpi slt, %100, %103 : vector<8x128xi32>
    %105 = arith.andi %102, %104 : vector<8x128xi1>
    %cst_30 = arith.constant 0.000000e+00 : f32
    %106 = vector.broadcast %cst_30 : f32 to vector<8x128xf32>
    %107 = arith.select %105, %98, %106 : vector<8x128xi1>, vector<8x128xf32>
    %108 = tpu.concatenate %97, %107 in 0 : vector<8x128xf32>, vector<8x128xf32> -> vector<16x128xf32>
    %109 = arith.truncf %108 : vector<16x128xf32> to vector<16x128xbf16>
    %c32 = arith.constant 32 : index
    %c0_31 = arith.constant 0 : index
    %110 = vector.load %arg6[%c32, %c0_31] : memref<160x128xbf16, #tpu.memory_space<vmem>>, vector<16x128xbf16>
    tpu.vector_store %arg6[%c32, %c0_31], %109 {strides = array<i32>} : memref<160x128xbf16, #tpu.memory_space<vmem>>, vector<16x128xbf16>,
    %111 = vector.extract_strided_slice %31 {offsets = [0, 121], sizes = [8, 128], strides = [1, 1]} : vector<8x256xf32> to vector<8x128xf32>
    %c12_i32 = arith.constant 12 : i32
    %112 = vector.broadcast %c12_i32 : i32 to vector<8x128xi32>
    %113 = arith.addi %26, %112 : vector<8x128xi32>
    %c0_i32_32 = arith.constant 0 : i32
    %114 = vector.broadcast %c0_i32_32 : i32 to vector<8x128xi32>
    %115 = arith.cmpi sge, %113, %114 : vector<8x128xi32>
    %c64_i32_33 = arith.constant 64 : i32
    %116 = vector.broadcast %c64_i32_33 : i32 to vector<8x128xi32>
    %117 = arith.cmpi slt, %113, %116 : vector<8x128xi32>
    %118 = arith.andi %115, %117 : vector<8x128xi1>
    %cst_34 = arith.constant 0.000000e+00 : f32
    %119 = vector.broadcast %cst_34 : f32 to vector<8x128xf32>
    %120 = arith.select %118, %111, %119 : vector<8x128xi1>, vector<8x128xf32>
    %121 = vector.extract_strided_slice %31 {offsets = [0, 123], sizes = [8, 128], strides = [1, 1]} : vector<8x256xf32> to vector<8x128xf32>
    %c14_i32 = arith.constant 14 : i32
    %122 = vector.broadcast %c14_i32 : i32 to vector<8x128xi32>
    %123 = arith.addi %26, %122 : vector<8x128xi32>
    %c0_i32_35 = arith.constant 0 : i32
    %124 = vector.broadcast %c0_i32_35 : i32 to vector<8x128xi32>
    %125 = arith.cmpi sge, %123, %124 : vector<8x128xi32>
    %c64_i32_36 = arith.constant 64 : i32
    %126 = vector.broadcast %c64_i32_36 : i32 to vector<8x128xi32>
    %127 = arith.cmpi slt, %123, %126 : vector<8x128xi32>
    %128 = arith.andi %125, %127 : vector<8x128xi1>
    %cst_37 = arith.constant 0.000000e+00 : f32
    %129 = vector.broadcast %cst_37 : f32 to vector<8x128xf32>
    %130 = arith.select %128, %121, %129 : vector<8x128xi1>, vector<8x128xf32>
    %131 = tpu.concatenate %120, %130 in 0 : vector<8x128xf32>, vector<8x128xf32> -> vector<16x128xf32>
    %132 = arith.truncf %131 : vector<16x128xf32> to vector<16x128xbf16>
    %c48 = arith.constant 48 : index
    %c0_38 = arith.constant 0 : index
    %133 = vector.load %arg6[%c48, %c0_38] : memref<160x128xbf16, #tpu.memory_space<vmem>>, vector<16x128xbf16>
    tpu.vector_store %arg6[%c48, %c0_38], %132 {strides = array<i32>} : memref<160x128xbf16, #tpu.memory_space<vmem>>, vector<16x128xbf16>,
    %134 = vector.extract_strided_slice %31 {offsets = [0, 125], sizes = [8, 128], strides = [1, 1]} : vector<8x256xf32> to vector<8x128xf32>
    %c16_i32 = arith.constant 16 : i32
    %135 = vector.broadcast %c16_i32 : i32 to vector<8x128xi32>
    %136 = arith.addi %26, %135 : vector<8x128xi32>
    %c0_i32_39 = arith.constant 0 : i32
    %137 = vector.broadcast %c0_i32_39 : i32 to vector<8x128xi32>
    %138 = arith.cmpi sge, %136, %137 : vector<8x128xi32>
    %c64_i32_40 = arith.constant 64 : i32
    %139 = vector.broadcast %c64_i32_40 : i32 to vector<8x128xi32>
    %140 = arith.cmpi slt, %136, %139 : vector<8x128xi32>
    %141 = arith.andi %138, %140 : vector<8x128xi1>
    %cst_41 = arith.constant 0.000000e+00 : f32
    %142 = vector.broadcast %cst_41 : f32 to vector<8x128xf32>
    %143 = arith.select %141, %134, %142 : vector<8x128xi1>, vector<8x128xf32>
    %144 = vector.extract_strided_slice %31 {offsets = [0, 127], sizes = [8, 128], strides = [1, 1]} : vector<8x256xf32> to vector<8x128xf32>
    %c18_i32 = arith.constant 18 : i32
    %145 = vector.broadcast %c18_i32 : i32 to vector<8x128xi32>
    %146 = arith.addi %26, %145 : vector<8x128xi32>
    %c0_i32_42 = arith.constant 0 : i32
    %147 = vector.broadcast %c0_i32_42 : i32 to vector<8x128xi32>
    %148 = arith.cmpi sge, %146, %147 : vector<8x128xi32>
    %c64_i32_43 = arith.constant 64 : i32
    %149 = vector.broadcast %c64_i32_43 : i32 to vector<8x128xi32>
    %150 = arith.cmpi slt, %146, %149 : vector<8x128xi32>
    %151 = arith.andi %148, %150 : vector<8x128xi1>
    %cst_44 = arith.constant 0.000000e+00 : f32
    %152 = vector.broadcast %cst_44 : f32 to vector<8x128xf32>
    %153 = arith.select %151, %144, %152 : vector<8x128xi1>, vector<8x128xf32>
    %154 = tpu.concatenate %143, %153 in 0 : vector<8x128xf32>, vector<8x128xf32> -> vector<16x128xf32>
    %155 = arith.truncf %154 : vector<16x128xf32> to vector<16x128xbf16>
    %c64 = arith.constant 64 : index
    %c0_45 = arith.constant 0 : index
    %156 = vector.load %arg6[%c64, %c0_45] : memref<160x128xbf16, #tpu.memory_space<vmem>>, vector<16x128xbf16>
    tpu.vector_store %arg6[%c64, %c0_45], %155 {strides = array<i32>} : memref<160x128xbf16, #tpu.memory_space<vmem>>, vector<16x128xbf16>,
    %157 = vector.extract_strided_slice %31 {offsets = [0, 1], sizes = [8, 128], strides = [1, 1]} : vector<8x256xf32> to vector<8x128xf32>
    %c20_i32 = arith.constant 20 : i32
    %158 = vector.broadcast %c20_i32 : i32 to vector<8x128xi32>
    %159 = arith.addi %26, %158 : vector<8x128xi32>
    %c0_i32_46 = arith.constant 0 : i32
    %160 = vector.broadcast %c0_i32_46 : i32 to vector<8x128xi32>
    %161 = arith.cmpi sge, %159, %160 : vector<8x128xi32>
    %c64_i32_47 = arith.constant 64 : i32
    %162 = vector.broadcast %c64_i32_47 : i32 to vector<8x128xi32>
    %163 = arith.cmpi slt, %159, %162 : vector<8x128xi32>
    %164 = arith.andi %161, %163 : vector<8x128xi1>
    %cst_48 = arith.constant 0.000000e+00 : f32
    %165 = vector.broadcast %cst_48 : f32 to vector<8x128xf32>
    %166 = arith.select %164, %157, %165 : vector<8x128xi1>, vector<8x128xf32>
    %167 = vector.extract_strided_slice %31 {offsets = [0, 3], sizes = [8, 128], strides = [1, 1]} : vector<8x256xf32> to vector<8x128xf32>
    %c22_i32 = arith.constant 22 : i32
    %168 = vector.broadcast %c22_i32 : i32 to vector<8x128xi32>
    %169 = arith.addi %26, %168 : vector<8x128xi32>
    %c0_i32_49 = arith.constant 0 : i32
    %170 = vector.broadcast %c0_i32_49 : i32 to vector<8x128xi32>
    %171 = arith.cmpi sge, %169, %170 : vector<8x128xi32>
    %c64_i32_50 = arith.constant 64 : i32
    %172 = vector.broadcast %c64_i32_50 : i32 to vector<8x128xi32>
    %173 = arith.cmpi slt, %169, %172 : vector<8x128xi32>
    %174 = arith.andi %171, %173 : vector<8x128xi1>
    %cst_51 = arith.constant 0.000000e+00 : f32
    %175 = vector.broadcast %cst_51 : f32 to vector<8x128xf32>
    %176 = arith.select %174, %167, %175 : vector<8x128xi1>, vector<8x128xf32>
    %177 = tpu.concatenate %166, %176 in 0 : vector<8x128xf32>, vector<8x128xf32> -> vector<16x128xf32>
    %178 = arith.truncf %177 : vector<16x128xf32> to vector<16x128xbf16>
    %c80 = arith.constant 80 : index
    %c0_52 = arith.constant 0 : index
    %179 = vector.load %arg6[%c80, %c0_52] : memref<160x128xbf16, #tpu.memory_space<vmem>>, vector<16x128xbf16>
    tpu.vector_store %arg6[%c80, %c0_52], %178 {strides = array<i32>} : memref<160x128xbf16, #tpu.memory_space<vmem>>, vector<16x128xbf16>,
    %180 = vector.extract_strided_slice %31 {offsets = [0, 5], sizes = [8, 128], strides = [1, 1]} : vector<8x256xf32> to vector<8x128xf32>
    %c24_i32 = arith.constant 24 : i32
    %181 = vector.broadcast %c24_i32 : i32 to vector<8x128xi32>
    %182 = arith.addi %26, %181 : vector<8x128xi32>
    %c0_i32_53 = arith.constant 0 : i32
    %183 = vector.broadcast %c0_i32_53 : i32 to vector<8x128xi32>
    %184 = arith.cmpi sge, %182, %183 : vector<8x128xi32>
    %c64_i32_54 = arith.constant 64 : i32
    %185 = vector.broadcast %c64_i32_54 : i32 to vector<8x128xi32>
    %186 = arith.cmpi slt, %182, %185 : vector<8x128xi32>
    %187 = arith.andi %184, %186 : vector<8x128xi1>
    %cst_55 = arith.constant 0.000000e+00 : f32
    %188 = vector.broadcast %cst_55 : f32 to vector<8x128xf32>
    %189 = arith.select %187, %180, %188 : vector<8x128xi1>, vector<8x128xf32>
    %190 = vector.extract_strided_slice %31 {offsets = [0, 7], sizes = [8, 128], strides = [1, 1]} : vector<8x256xf32> to vector<8x128xf32>
    %c26_i32 = arith.constant 26 : i32
    %191 = vector.broadcast %c26_i32 : i32 to vector<8x128xi32>
    %192 = arith.addi %26, %191 : vector<8x128xi32>
    %c0_i32_56 = arith.constant 0 : i32
    %193 = vector.broadcast %c0_i32_56 : i32 to vector<8x128xi32>
    %194 = arith.cmpi sge, %192, %193 : vector<8x128xi32>
    %c64_i32_57 = arith.constant 64 : i32
    %195 = vector.broadcast %c64_i32_57 : i32 to vector<8x128xi32>
    %196 = arith.cmpi slt, %192, %195 : vector<8x128xi32>
    %197 = arith.andi %194, %196 : vector<8x128xi1>
    %cst_58 = arith.constant 0.000000e+00 : f32
    %198 = vector.broadcast %cst_58 : f32 to vector<8x128xf32>
    %199 = arith.select %197, %190, %198 : vector<8x128xi1>, vector<8x128xf32>
    %200 = tpu.concatenate %189, %199 in 0 : vector<8x128xf32>, vector<8x128xf32> -> vector<16x128xf32>
    %201 = arith.truncf %200 : vector<16x128xf32> to vector<16x128xbf16>
    %c96 = arith.constant 96 : index
    %c0_59 = arith.constant 0 : index
    %202 = vector.load %arg6[%c96, %c0_59] : memref<160x128xbf16, #tpu.memory_space<vmem>>, vector<16x128xbf16>
    tpu.vector_store %arg6[%c96, %c0_59], %201 {strides = array<i32>} : memref<160x128xbf16, #tpu.memory_space<vmem>>, vector<16x128xbf16>,
    %203 = vector.extract_strided_slice %31 {offsets = [0, 9], sizes = [8, 128], strides = [1, 1]} : vector<8x256xf32> to vector<8x128xf32>
    %c28_i32 = arith.constant 28 : i32
    %204 = vector.broadcast %c28_i32 : i32 to vector<8x128xi32>
    %205 = arith.addi %26, %204 : vector<8x128xi32>
    %c0_i32_60 = arith.constant 0 : i32
    %206 = vector.broadcast %c0_i32_60 : i32 to vector<8x128xi32>
    %207 = arith.cmpi sge, %205, %206 : vector<8x128xi32>
    %c64_i32_61 = arith.constant 64 : i32
    %208 = vector.broadcast %c64_i32_61 : i32 to vector<8x128xi32>
    %209 = arith.cmpi slt, %205, %208 : vector<8x128xi32>
    %210 = arith.andi %207, %209 : vector<8x128xi1>
    %cst_62 = arith.constant 0.000000e+00 : f32
    %211 = vector.broadcast %cst_62 : f32 to vector<8x128xf32>
    %212 = arith.select %210, %203, %211 : vector<8x128xi1>, vector<8x128xf32>
    %213 = vector.extract_strided_slice %31 {offsets = [0, 11], sizes = [8, 128], strides = [1, 1]} : vector<8x256xf32> to vector<8x128xf32>
    %c30_i32 = arith.constant 30 : i32
    %214 = vector.broadcast %c30_i32 : i32 to vector<8x128xi32>
    %215 = arith.addi %26, %214 : vector<8x128xi32>
    %c0_i32_63 = arith.constant 0 : i32
    %216 = vector.broadcast %c0_i32_63 : i32 to vector<8x128xi32>
    %217 = arith.cmpi sge, %215, %216 : vector<8x128xi32>
    %c64_i32_64 = arith.constant 64 : i32
    %218 = vector.broadcast %c64_i32_64 : i32 to vector<8x128xi32>
    %219 = arith.cmpi slt, %215, %218 : vector<8x128xi32>
    %220 = arith.andi %217, %219 : vector<8x128xi1>
    %cst_65 = arith.constant 0.000000e+00 : f32
    %221 = vector.broadcast %cst_65 : f32 to vector<8x128xf32>
    %222 = arith.select %220, %213, %221 : vector<8x128xi1>, vector<8x128xf32>
    %223 = tpu.concatenate %212, %222 in 0 : vector<8x128xf32>, vector<8x128xf32> -> vector<16x128xf32>
    %224 = arith.truncf %223 : vector<16x128xf32> to vector<16x128xbf16>
    %c112 = arith.constant 112 : index
    %c0_66 = arith.constant 0 : index
    %225 = vector.load %arg6[%c112, %c0_66] : memref<160x128xbf16, #tpu.memory_space<vmem>>, vector<16x128xbf16>
    tpu.vector_store %arg6[%c112, %c0_66], %224 {strides = array<i32>} : memref<160x128xbf16, #tpu.memory_space<vmem>>, vector<16x128xbf16>,
    %226 = vector.extract_strided_slice %31 {offsets = [0, 13], sizes = [8, 128], strides = [1, 1]} : vector<8x256xf32> to vector<8x128xf32>
    %c32_i32 = arith.constant 32 : i32
    %227 = vector.broadcast %c32_i32 : i32 to vector<8x128xi32>
    %228 = arith.addi %26, %227 : vector<8x128xi32>
    %c0_i32_67 = arith.constant 0 : i32
    %229 = vector.broadcast %c0_i32_67 : i32 to vector<8x128xi32>
    %230 = arith.cmpi sge, %228, %229 : vector<8x128xi32>
    %c64_i32_68 = arith.constant 64 : i32
    %231 = vector.broadcast %c64_i32_68 : i32 to vector<8x128xi32>
    %232 = arith.cmpi slt, %228, %231 : vector<8x128xi32>
    %233 = arith.andi %230, %232 : vector<8x128xi1>
    %cst_69 = arith.constant 0.000000e+00 : f32
    %234 = vector.broadcast %cst_69 : f32 to vector<8x128xf32>
    %235 = arith.select %233, %226, %234 : vector<8x128xi1>, vector<8x128xf32>
    %236 = vector.extract_strided_slice %31 {offsets = [0, 15], sizes = [8, 128], strides = [1, 1]} : vector<8x256xf32> to vector<8x128xf32>
    %c34_i32 = arith.constant 34 : i32
    %237 = vector.broadcast %c34_i32 : i32 to vector<8x128xi32>
    %238 = arith.addi %26, %237 : vector<8x128xi32>
    %c0_i32_70 = arith.constant 0 : i32
    %239 = vector.broadcast %c0_i32_70 : i32 to vector<8x128xi32>
    %240 = arith.cmpi sge, %238, %239 : vector<8x128xi32>
    %c64_i32_71 = arith.constant 64 : i32
    %241 = vector.broadcast %c64_i32_71 : i32 to vector<8x128xi32>
    %242 = arith.cmpi slt, %238, %241 : vector<8x128xi32>
    %243 = arith.andi %240, %242 : vector<8x128xi1>
    %cst_72 = arith.constant 0.000000e+00 : f32
    %244 = vector.broadcast %cst_72 : f32 to vector<8x128xf32>
    %245 = arith.select %243, %236, %244 : vector<8x128xi1>, vector<8x128xf32>
    %246 = tpu.concatenate %235, %245 in 0 : vector<8x128xf32>, vector<8x128xf32> -> vector<16x128xf32>
    %247 = arith.truncf %246 : vector<16x128xf32> to vector<16x128xbf16>
    %c128 = arith.constant 128 : index
    %c0_73 = arith.constant 0 : index
    %248 = vector.load %arg6[%c128, %c0_73] : memref<160x128xbf16, #tpu.memory_space<vmem>>, vector<16x128xbf16>
    tpu.vector_store %arg6[%c128, %c0_73], %247 {strides = array<i32>} : memref<160x128xbf16, #tpu.memory_space<vmem>>, vector<16x128xbf16>,
    %249 = vector.extract_strided_slice %31 {offsets = [0, 17], sizes = [8, 128], strides = [1, 1]} : vector<8x256xf32> to vector<8x128xf32>
    %c36_i32 = arith.constant 36 : i32
    %250 = vector.broadcast %c36_i32 : i32 to vector<8x128xi32>
    %251 = arith.addi %26, %250 : vector<8x128xi32>
    %c0_i32_74 = arith.constant 0 : i32
    %252 = vector.broadcast %c0_i32_74 : i32 to vector<8x128xi32>
    %253 = arith.cmpi sge, %251, %252 : vector<8x128xi32>
    %c64_i32_75 = arith.constant 64 : i32
    %254 = vector.broadcast %c64_i32_75 : i32 to vector<8x128xi32>
    %255 = arith.cmpi slt, %251, %254 : vector<8x128xi32>
    %256 = arith.andi %253, %255 : vector<8x128xi1>
    %cst_76 = arith.constant 0.000000e+00 : f32
    %257 = vector.broadcast %cst_76 : f32 to vector<8x128xf32>
    %258 = arith.select %256, %249, %257 : vector<8x128xi1>, vector<8x128xf32>
    %259 = vector.extract_strided_slice %31 {offsets = [0, 19], sizes = [8, 128], strides = [1, 1]} : vector<8x256xf32> to vector<8x128xf32>
    %c19_i32_77 = arith.constant 19 : i32
    %260 = vector.broadcast %c19_i32_77 : i32 to vector<8x128xi32>
    %261 = arith.addi %20, %260 : vector<8x128xi32>
    %c0_i32_78 = arith.constant 0 : i32
    %262 = vector.broadcast %c0_i32_78 : i32 to vector<8x128xi32>
    %263 = arith.cmpi sge, %261, %262 : vector<8x128xi32>
    %c64_i32_79 = arith.constant 64 : i32
    %264 = vector.broadcast %c64_i32_79 : i32 to vector<8x128xi32>
    %265 = arith.cmpi slt, %261, %264 : vector<8x128xi32>
    %266 = arith.andi %263, %265 : vector<8x128xi1>
    %cst_80 = arith.constant 0.000000e+00 : f32
    %267 = vector.broadcast %cst_80 : f32 to vector<8x128xf32>
    %268 = arith.select %266, %259, %267 : vector<8x128xi1>, vector<8x128xf32>
    %269 = arith.select %4, %268, %41 : vector<8x128xi1>, vector<8x128xf32>
    %270 = tpu.concatenate %258, %269 in 0 : vector<8x128xf32>, vector<8x128xf32> -> vector<16x128xf32>
    %271 = arith.truncf %270 : vector<16x128xf32> to vector<16x128xbf16>
    %c144 = arith.constant 144 : index
    %c0_81 = arith.constant 0 : index
    %272 = vector.load %arg6[%c144, %c0_81] : memref<160x128xbf16, #tpu.memory_space<vmem>>, vector<16x128xbf16>
    tpu.vector_store %arg6[%c144, %c0_81], %271 {strides = array<i32>} : memref<160x128xbf16, #tpu.memory_space<vmem>>, vector<16x128xbf16>,
    %c0_82 = arith.constant 0 : index
    %c0_83 = arith.constant 0 : index
    %273 = vector.load %arg2[%c0_82, %c0_83] : memref<32x160xbf16, #tpu.memory_space<vmem>>, vector<32x160xbf16>
    %c0_84 = arith.constant 0 : index
    %c0_85 = arith.constant 0 : index
    %274 = vector.load %arg6[%c0_84, %c0_85] : memref<160x128xbf16, #tpu.memory_space<vmem>>, vector<160x128xbf16>
    %cst_86 = arith.constant dense<0.000000e+00> : vector<32x128xf32>
    %275 = tpu.matmul %273, %274, %cst_86 {dimension_numbers = #tpu.dot_dimension_numbers<[1], [0], [0], [1], [0, 0, 1, 1], [], []>} : vector<32x160xbf16>, vector<160x128xbf16>, vector<32x128xf32> -> vector<32x128xf32>
    %cst_87 = arith.constant dense<0.000000e+00> : vector<32xf32>
    %276 = vector.multi_reduction <add>, %275, %cst_87 [1] : vector<32x128xf32> to vector<32xf32>
    %277 = vector.shape_cast %276 : vector<32xf32> to vector<32x1xf32>
    %cst_88 = arith.constant 7.812500e-03 : f32
    %278 = vector.broadcast %cst_88 : f32 to vector<32x1xf32>
    %279 = arith.mulf %277, %278 : vector<32x1xf32>
    %280 = vector.broadcast %279 : vector<32x1xf32> to vector<32x128xf32>
    %281 = arith.subf %275, %280 : vector<32x128xf32>
    %282 = arith.mulf %281, %281 : vector<32x128xf32>
    %cst_89 = arith.constant dense<0.000000e+00> : vector<32xf32>
    %283 = vector.multi_reduction <add>, %282, %cst_89 [1] : vector<32x128xf32> to vector<32xf32>
    %284 = vector.shape_cast %283 : vector<32xf32> to vector<32x1xf32>
    %cst_90 = arith.constant 7.812500e-03 : f32
    %285 = vector.broadcast %cst_90 : f32 to vector<32x1xf32>
    %286 = arith.mulf %284, %285 : vector<32x1xf32>
    %c0_91 = arith.constant 0 : index
    %c0_92 = arith.constant 0 : index
    %287 = vector.load %arg3[%c0_91, %c0_92] : memref<32x1xf32, #tpu.memory_space<vmem>>, vector<32x1xf32>
    %cst_93 = arith.constant 9.99999974E-6 : f32
    %288 = vector.broadcast %cst_93 : f32 to vector<32x1xf32>
    %289 = arith.addf %286, %288 : vector<32x1xf32>
    %290 = math.rsqrt %289 : vector<32x1xf32>
    %291 = arith.mulf %287, %290 : vector<32x1xf32>
    %292 = vector.broadcast %291 : vector<32x1xf32> to vector<32x128xf32>
    %293 = arith.mulf %281, %292 : vector<32x128xf32>
    %c0_94 = arith.constant 0 : index
    %c0_95 = arith.constant 0 : index
    %294 = vector.load %arg4[%c0_94, %c0_95] : memref<32x1xf32, #tpu.memory_space<vmem>>, vector<32x1xf32>
    %295 = vector.broadcast %294 : vector<32x1xf32> to vector<32x128xf32>
    %296 = arith.addf %293, %295 : vector<32x128xf32>
    %cst_96 = arith.constant 0.000000e+00 : f32
    %297 = vector.broadcast %cst_96 : f32 to vector<32x128xf32>
    %298 = arith.maximumf %296, %297 : vector<32x128xf32>
    %c0_97 = arith.constant 0 : index
    %c0_98 = arith.constant 0 : index
    %299 = vector.load %arg5[%c0_97, %c0_98] : memref<32x128xf32, #tpu.memory_space<vmem>>, vector<32x128xf32>
    tpu.vector_store %arg5[%c0_97, %c0_98], %298 {strides = array<i32>} : memref<32x128xf32, #tpu.memory_space<vmem>>, vector<32x128xf32>,
    return
  }
  func.func @transform_0(%arg0: i32) -> (i32, i32) {
    %c0_i32 = arith.constant 0 : i32
    %c0_i32_0 = arith.constant 0 : i32
    %c0_i32_1 = arith.constant 0 : i32
    return %c0_i32, %c0_i32_0 : i32, i32
  }
  func.func @transform_1(%arg0: i32) -> (i32, i32) {
    %c0_i32 = arith.constant 0 : i32
    %c0_i32_0 = arith.constant 0 : i32
    %c0_i32_1 = arith.constant 0 : i32
    return %c0_i32, %c0_i32_0 : i32, i32
  }
  func.func @transform_2(%arg0: i32) -> (i32, i32) {
    %c0_i32 = arith.constant 0 : i32
    %c0_i32_0 = arith.constant 0 : i32
    %c0_i32_1 = arith.constant 0 : i32
    return %c0_i32, %c0_i32_0 : i32, i32
  }
  func.func @transform_3(%arg0: i32) -> (i32, i32) {
    %c0_i32 = arith.constant 0 : i32
    %c0_i32_0 = arith.constant 0 : i32
    %c0_i32_1 = arith.constant 0 : i32
    return %c0_i32, %c0_i32_0 : i32, i32
  }
  func.func @transform_4(%arg0: i32) -> (i32, i32) {
    %c0_i32 = arith.constant 0 : i32
    %c0_i32_0 = arith.constant 0 : i32
    %c0_i32_1 = arith.constant 0 : i32
    return %c0_i32, %c0_i32_0 : i32, i32
  }
}

</mosaic_0001>

<bundles_post_ra>
// kernel: tpu_custom_call.1
= control target key start
LH: loop header
LB: loop body
LE: loop exit
PB: predicated region body
PF: predicated region fallthrough
CT: control target
= control target key end

     0   :  { %s971_s0 = inlined_call_operand.vmem [shape: f32[8,128], index: 0, kind: input, shape index: {}]   ;;  %s972_s1 = inlined_call_operand.vmem [shape: bf16[32,160], index: 1, kind: input, shape index: {}]   ;;  %s973_s2 = inlined_call_operand.vmem [shape: f32[32,1], index: 2, kind: input, shape index: {}]   ;;  %s974_s3 = inlined_call_operand.vmem [shape: f32[32,1], index: 3, kind: input, shape index: {}]   ;;  %s975_s4 = inlined_call_operand.hbm [shape: f32[32,128], index: 4, kind: output, shape index: {}]  }
   0x1   :  { %v826_v0 = vld [vmem:[%s971_s0] sm:$0xff] }
   0x2   :  { %9 = vsyncpa [#allocation4], 0  ;;  %s773_s17 = smov 127   ;;  %v20_v1 = vlaneseq  ;;  %s774_s18 = smov 121   ;;  %v793_v11 = vmov 1  }
   0x3   :  { %41 = vrot.lane.b32.xlu0 %v826_v0, %s773_s17  ;;  %s775_s0 = smov 117   ;;  %s776_s19 = smov 119  }
   0x4   :  { %v829_v2 = vshrl.u32 %v20_v1, 7  ;;  %s777_s20 = smov 1   ;;  %s778_s21 = smov 123   ;;  %v23_v7 = vand.u32 127, %v20_v1 }
   0x5   :  { %s779_s22 = smov 3   ;;  %s780_s23 = smov 125  }
   0x6   :  { %vm24_vm0 = vcmp.lt.s32.totalorder %v829_v2, 4  ;;  %s781_s24 = smov 109   ;;  %s782_s25 = smov 7   ;;  %v839_v8 = vand.u32 63, %v23_v7 }
   0x7   :  { %s783_s26 = smov 111   ;;  %s784_s27 = smov 5   ;;  %v38_v12 = vsel %vm24_vm0, 0, %v793_v11 }
   0x8   :  { %s785_s28 = smov 113   ;;  %s786_s29 = smov 115   ;;  %v566_v9 = vadd.s32 4294967277, %v839_v8  ;;  %v244_v44 = vadd.s32 19, %v839_v8 }
   0x9   :  { %s787_s30 = smov 11   ;;  %s788_s5 = smov 15  }
   0xa   :  { %s789_s6 = smov 9   ;;  %s790_s7 = smov 13   ;;  %v844_v13 = vadd.s32 %v566_v9, %v38_v12 }
   0xb   :  { %s791_s8 = smov 17   ;;  %s792_s9 = smov 19  }
   0xc   :  { %v144_v14 = vadd.s32 18, %v844_v13  ;;  %v136_v15 = vadd.s32 16, %v844_v13  ;;  %v204_v18 = vadd.s32 30, %v844_v13  ;;  %v196_v20 = vadd.s32 28, %v844_v13  ;;  %s554_s16 = sshll.u32 %s975_s4, 4  ;;  %s555_s16 = int_to_ptr.hbm [resolvable:$true] %s554_s16 }
   0xd   :  { %v184_v24 = vadd.s32 26, %v844_v13  ;;  %v176_v25 = vadd.s32 24, %v844_v13  ;;  %v156_v31 = vadd.s32 20, %v844_v13  ;;  %v164_v32 = vadd.s32 22, %v844_v13 }
   0xe   :  { %vm145_vm1 = vcmp.ge.s32.totalorder %v144_v14, 0  ;;  %vm146_vm2 = vcmp.lt.s32.totalorder %v144_v14, 64  ;;  %vm137_vm3 = vcmp.ge.s32.totalorder %v136_v15, 0  ;;  %vm138_vm4 = vcmp.lt.s32.totalorder %v136_v15, 64 }
   0xf   :  { %vm147_vm5 = vmand %vm145_vm1, %vm146_vm2  ;;  %vm205_vm7 = vcmp.ge.s32.totalorder %v204_v18, 0  ;;  %vm206_vm8 = vcmp.lt.s32.totalorder %v204_v18, 64  ;;  %vm197_vm9 = vcmp.ge.s32.totalorder %v196_v20, 0  ;;  %vm198_vm10 = vcmp.lt.s32.totalorder %v196_v20, 64 }
  0x10   :  { %vm139_vm6 = vmand %vm137_vm3, %vm138_vm4  ;;  %vm185_vm13 = vcmp.ge.s32.totalorder %v184_v24, 0  ;;  %vm186_vm14 = vcmp.lt.s32.totalorder %v184_v24, 64  ;;  %vm177_vm15 = vcmp.ge.s32.totalorder %v176_v25, 0  ;;  %vm178_vm1 = vcmp.lt.s32.totalorder %v176_v25, 64 }
  0x11   :  { %vm207_vm11 = vmand %vm205_vm7, %vm206_vm8  ;;  %vm46_vm4 = vcmp.eq.s32.totalorder %v839_v8, 0  ;;  %vm165_vm7 = vcmp.ge.s32.totalorder %v164_v32, 0  ;;  %vm166_vm8 = vcmp.lt.s32.totalorder %v164_v32, 64  ;;  %v116_v42 = vadd.s32 12, %v844_v13 }
  0x12   :  { %vm199_vm12 = vmand %vm197_vm9, %vm198_vm10  ;;  %v236_v45 = vadd.s32 36, %v844_v13  ;;  %v124_v48 = vadd.s32 14, %v844_v13  ;;  %v224_v57 = vadd.s32 34, %v844_v13  ;;  %v216_v60 = vadd.s32 32, %v844_v13 }
  0x13   :  { %vm187_vm2 = vmand %vm185_vm13, %vm186_vm14  ;;  %vm118_vm13 = vcmp.lt.s32.totalorder %v116_v42, 64  ;;  %vm246_vm14 = vcmp.lt.s32.totalorder %v244_v44, 64  ;;  %v76_v2 = vadd.s32 4, %v844_v13  ;;  %v96_v9 = vadd.s32 8, %v844_v13  ;;  %v577_v44 = vld [vmem:[%s972_s1 + $0x10] sm:$0xf] }
  0x14   :  { %vm179_vm3 = vmand %vm177_vm15, %vm178_vm1  ;;  %vm237_vm15 = vcmp.ge.s32.totalorder %v236_v45, 0  ;;  %vm238_vm1 = vcmp.lt.s32.totalorder %v236_v45, 64  ;;  %v104_v11 = vadd.s32 10, %v844_v13  ;;  %v84_v14 = vadd.s32 6, %v844_v13  ;;  %v628_v45 = vld [vmem:[%s972_s1 + $0x14] sm:$0xf0] }
  0x15   :  { %vm167_vm10 = vmand %vm165_vm7, %vm166_vm8  ;;  %vm225_vm7 = vcmp.ge.s32.totalorder %v224_v57, 0  ;;  %vm226_vm8 = vcmp.lt.s32.totalorder %v224_v57, 64 }
  0x75   :  { %v832_v3 = vpop.permute.xlu0 %41 }
  0x76   :  { %v44_v4 = vrot.slane %v832_v3, 4 }
  0x78   :  { %v45_v5 = vsel %vm24_vm0, %v826_v0, %v44_v4 }
  0x79   :  { %188 = vrot.lane.b32.xlu2 %v45_v5, %s774_s18  ;;  %208 = vrot.lane.b32.xlu1 %v45_v5, %s775_s0  ;;  %v731_v6 = vpack.i.bf16 %v45_v5, %v826_v0  ;;  %s797_s18 = smov 8  }
  0x7a   :  { %200 = vrot.lane.b32.xlu0 %v45_v5, %s776_s19 }
  0x81   :  { %732 = vrot.lane.b32.xlu2 %v731_v6, %s777_s20  ;;  %180 = vrot.lane.b32.xlu1 %v45_v5, %s778_s21 }
  0x82   :  { %160 = vrot.lane.b32.xlu0 %v45_v5, %s773_s17  ;;  %s796_s17 = smov 128  }
  0x89   :  { %140 = vrot.lane.b32.xlu2 %v45_v5, %s779_s22  ;;  %168 = vrot.lane.b32.xlu1 %v45_v5, %s780_s23 }
  0x8a   :  { %248 = vrot.lane.b32.xlu0 %v45_v5, %s781_s24 }
  0x91   :  { %120 = vrot.lane.b32.xlu2 %v45_v5, %s782_s25  ;;  %240 = vrot.lane.b32.xlu1 %v45_v5, %s783_s26 }
  0x92   :  { %128 = vrot.lane.b32.xlu0 %v45_v5, %s784_s27 }
  0x99   :  { %228 = vrot.lane.b32.xlu2 %v45_v5, %s785_s28  ;;  %220 = vrot.lane.b32.xlu1 %v45_v5, %s786_s29 }
  0x9a   :  { %100 = vrot.lane.b32.xlu0 %v45_v5, %s787_s30 }
  0xa1   :  { %80 = vrot.lane.b32.xlu2 %v45_v5, %s788_s5  ;;  %108 = vrot.lane.b32.xlu1 %v45_v5, %s789_s6 }
  0xa2   :  { %88 = vrot.lane.b32.xlu0 %v45_v5, %s790_s7 }
  0xa9   :  { %68 = vrot.lane.b32.xlu2 %v45_v5, %s791_s8  ;;  %60 = vrot.lane.b32.xlu1 %v45_v5, %s792_s9 }
  0xd3   :  { %v189_v10 = vpop.permute.xlu2 %188 }
  0xd4   :  { %v191_v35 = vsel %vm187_vm2, %v189_v10, 0.0  ;;  %vm125_vm2 = vcmp.ge.s32.totalorder %v124_v48, 0 }
  0xdb   :  { %v733_v16 = vpop.permute.xlu2 %732 }
  0xdc   :  { %v735_v17 = vunpack.i.h.bf16 %v733_v16  ;;  %v734_v33 = vunpack.i.l.bf16 %v733_v16 }
  0xde   :  { %v151_v22 = vsel %vm147_vm5, %v735_v17, 0.0  ;;  %vm157_vm5 = vcmp.ge.s32.totalorder %v156_v31, 0  ;;  %v50_v39 = vsel %vm46_vm4, %v826_v0, %v734_v33 }
  0xdf   :  { %v53_v43 = vmax.f32 %v826_v0, %v50_v39 }
  0xe3   :  { %v141_v19 = vpop.permute.xlu2 %140 }
  0xe4   :  { %v143_v21 = vsel %vm139_vm6, %v141_v19, 0.0  ;;  %vm158_vm6 = vcmp.lt.s32.totalorder %v156_v31, 64 }
  0xe5   :  { %v662_v23 = vpack.c.bf16 %v151_v22, %v143_v21  ;;  %vm856_vm9 = vmand %vm157_vm5, %vm158_vm6 }
  0xe6   :  { %vm239_vm5 = vmand %vm237_vm15, %vm238_vm1  ;;  %vm98_vm15 = vcmp.lt.s32.totalorder %v96_v9, 64  ;;  %vm105_vm1 = vcmp.ge.s32.totalorder %v104_v11, 0 }
  0xe7   :  { %692 = vst [vmem:[#allocation2 + $0x48] sm:$0xff] %v662_v23   ;;  %v64_v23 = vadd.s32 2, %v844_v13 }
  0xeb   :  { %v209_v26 = vpop.permute.xlu1 %208  ;;  %v121_v46 = vpop.permute.xlu2 %120 }
  0xec   :  { %v211_v27 = vsel %vm207_vm11, %v209_v26, 0.0  ;;  %v201_v28 = vpop.permute.xlu0 %200  ;;  %vm51_vm11 = vcmp.eq.s32.totalorder %v839_v8, 63 }
  0xed   :  { %v203_v29 = vsel %vm199_vm12, %v201_v28, 0.0  ;;  %v52_v52 = vsel %vm51_vm11, %v826_v0, %v832_v3  ;;  %vm117_vm12 = vcmp.ge.s32.totalorder %v116_v42, 0  ;;  %vm880_vm11 = vmand %vm225_vm7, %vm226_vm8  ;;  %v625_v28 = vld [vmem:[%s972_s1 + $0x4] sm:$0xf] }
  0xee   :  { %v677_v30 = vpack.c.bf16 %v211_v27, %v203_v29  ;;  %v54_v55 = vmax.f32 %v53_v43, %v52_v52  ;;  %vm870_vm4 = vmand %vm117_vm12, %vm118_vm13  ;;  %v633_v10 = vld [vmem:[#allocation2 + $0x48] sm:$0xff]  ;;  %vm77_vm12 = vcmp.ge.s32.totalorder %v76_v2, 0  ;;  %vm78_vm13 = vcmp.lt.s32.totalorder %v76_v2, 64  ;;  %v569_v43 = vld [vmem:[%s972_s1] sm:$0xf] }
  0xef   :  { %v123_v1 = vsel %vm870_vm4, %v121_v46, 0.0  ;;  %vm85_vm4 = vcmp.ge.s32.totalorder %v84_v14, 0  ;;  %v571_v29 = vld [vmem:[%s972_s1 + $0x8] sm:$0xf0]  ;;  %v627_v46 = vld [vmem:[%s972_s1 + $0x14] sm:$0xf] }
  0xf0   :  { %695 = vst [vmem:[#allocation2 + $0x20] sm:$0xff] %v677_v30   ;;  %v55_v59 = vrot.slane %v54_v55, 4 }
  0xf3   :  { %v181_v34 = vpop.permute.xlu1 %180  ;;  %v229_v3 = vpop.permute.xlu2 %228 }
  0xf4   :  { %v183_v36 = vsel %vm179_vm3, %v181_v34, 0.0  ;;  %v161_v37 = vpop.permute.xlu0 %160  ;;  %vm126_vm3 = vcmp.lt.s32.totalorder %v124_v48, 64  ;;  %v231_v15 = vsel %vm880_vm11, %v229_v3, 0.0  ;;  %vm359_vm11 = vcmask 261120  }
  0xf5   :  { %v672_v38 = vpack.c.bf16 %v191_v35, %v183_v36  ;;  %v163_v49 = vsel %vm856_vm9, %v161_v37, 0.0  ;;  %vm127_vm6 = vmand %vm125_vm2, %vm126_vm3  ;;  %vm217_vm9 = vcmp.ge.s32.totalorder %v216_v60, 0  ;;  %vm106_vm2 = vcmp.lt.s32.totalorder %v104_v11, 64 }
  0xf6   :  { %vm890_vm3 = vmand %vm77_vm12, %vm78_vm13  ;;  %v574_v35 = vor.u32 %v625_v28, %v571_v29  ;;  %vm56_vm12 = vcmp.ge.s32.totalorder %v844_v13, 0  ;;  %v626_v13 = vld [vmem:[%s972_s1 + $0x4] sm:$0xf0] }
  0xf7   :  { %694 = vst [vmem:[#allocation2 + $0x8] sm:$0xff] %v672_v38   ;;  %v636_v40 = vld [vmem:[#allocation2 + $0x20] sm:$0xff]  ;;  %vm107_vm7 = vmand %vm105_vm1, %vm106_vm2 }
  0xf8   :  { %366 = vmatpush.bf16.msra.mxu0 %v636_v40  ;;  %698 = vmatpush.bf16.msra.mxu2 %v636_v40 }
  0xfb   :  { %v169_v47 = vpop.permute.xlu1 %168  ;;  %v81_v21 = vpop.permute.xlu2 %80 }
  0xfc   :  { %v171_v50 = vsel %vm167_vm10, %v169_v47, 0.0  ;;  %v249_v51 = vpop.permute.xlu0 %248  ;;  %vm218_vm10 = vcmp.lt.s32.totalorder %v216_v60, 64  ;;  %v83_v30 = vsel %vm890_vm3, %v81_v21, 0.0  ;;  %v579_v47 = vld [vmem:[%s972_s1 + $0x18] sm:$0xf0] }
  0xfd   :  { %v667_v53 = vpack.c.bf16 %v171_v50, %v163_v49  ;;  %v251_v58 = vsel %vm246_vm14, %v249_v51, 0.0  ;;  %vm97_vm14 = vcmp.ge.s32.totalorder %v96_v9, 0  ;;  %v570_v49 = vor.u32 %v626_v13, %v569_v43 }
  0xfe   :  { %v635_v54 = vld [vmem:[#allocation2 + $0x8] sm:$0xff]  ;;  %v252_v63 = vsel %vm24_vm0, %v251_v58, %v55_v59  ;;  %vm219_vm0 = vmand %vm217_vm9, %vm218_vm10  ;;  %vm65_vm9 = vcmp.ge.s32.totalorder %v64_v23, 0  ;;  %vm66_vm10 = vcmp.lt.s32.totalorder %v64_v23, 64  ;;  %v578_v50 = vor.u32 %v628_v45, %v577_v44 }
  0xff   :  { %693 = vst [vmem:[#allocation2 + $0x28] sm:$0xff] %v667_v53   ;;  %367 = vmatpush.bf16.msra.mxu0 %v635_v54  ;;  %699 = vmatpush.bf16.msra.mxu2 %v635_v54  ;;  %v582_v51 = vor.u32 %v627_v46, %v579_v47 }
 0x103   :  { %v241_v61 = vpop.permute.xlu1 %240  ;;  %v69_v36 = vpop.permute.xlu2 %68 }
 0x104   :  { %v243_v62 = vsel %vm239_vm5, %v241_v61, 0.0  ;;  %v129_v0 = vpop.permute.xlu0 %128  ;;  %vm86_vm5 = vcmp.lt.s32.totalorder %v84_v14, 64 }
 0x105   :  { %v687_v4 = vpack.c.bf16 %v252_v63, %v243_v62  ;;  %v131_v5 = vsel %vm127_vm6, %v129_v0, 0.0  ;;  %vm99_vm6 = vmand %vm97_vm14, %vm98_vm15 }
 0x106   :  { %v657_v6 = vpack.c.bf16 %v131_v5, %v123_v1  ;;  %v634_v7 = vld [vmem:[#allocation2 + $0x28] sm:$0xff]  ;;  %vm87_vm8 = vmand %vm85_vm4, %vm86_vm5 }
 0x107   :  { %697 = vst [vmem:[#allocation2 + $0x38] sm:$0xff] %v687_v4   ;;  %368 = vmatpush.bf16.msra.mxu0 %v634_v7  ;;  %700 = vmatpush.bf16.msra.mxu2 %v634_v7 }
 0x108   :  { %691 = vst [vmem:[#allocation2 + $0x10] sm:$0xff] %v657_v6  }
 0x10b   :  { %v221_v12 = vpop.permute.xlu1 %220  ;;  %369 = vmatpush.bf16.msra.mxu0 %v633_v10  ;;  %701 = vmatpush.bf16.msra.mxu2 %v633_v10 }
 0x10c   :  { %v223_v16 = vsel %vm219_vm0, %v221_v12, 0.0  ;;  %v101_v17 = vpop.permute.xlu0 %100  ;;  %vm67_vm0 = vmand %vm65_vm9, %vm66_vm10 }
 0x10d   :  { %v682_v18 = vpack.c.bf16 %v231_v15, %v223_v16  ;;  %v103_v25 = vsel %vm99_vm6, %v101_v17, 0.0  ;;  %v71_v38 = vsel %vm67_vm0, %v69_v36, 0.0  ;;  %v794_v17 = vmov 0  }
 0x10e   :  { %v638_v19 = vld [vmem:[#allocation2 + $0x38] sm:$0xff]  ;;  %738 = vset.pattern.permute.xlu2 %v794_v17  ;;  %736 = vset.pattern.permute.xlu1 %v794_v17 }
 0x10f   :  { %696 = vst [vmem:[#allocation2 + $0x40] sm:$0xff] %v682_v18   ;;  %v632_v22 = vld [vmem:[#allocation2 + $0x10] sm:$0xff]  ;;  %391 = vmatpush.bf16.msra.mxu1 %v638_v19  ;;  %v512_v18 = vld [vmem:[%s974_s3] sm:$0xff]  ;;  %737 = vset.pattern.permute.xlu0 %v794_v17 }
 0x110   :  { %370 = vmatpush.bf16.msra.mxu0 %v632_v22  ;;  %702 = vmatpush.bf16.msra.mxu2 %v632_v22 }
 0x113   :  { %v109_v24 = vpop.permute.xlu1 %108 }
 0x114   :  { %v111_v26 = vsel %vm107_vm7, %v109_v24, 0.0  ;;  %v89_v27 = vpop.permute.xlu0 %88 }
 0x115   :  { %v652_v31 = vpack.c.bf16 %v111_v26, %v103_v25  ;;  %v91_v32 = vsel %vm87_vm8, %v89_v27, 0.0 }
 0x116   :  { %v647_v33 = vpack.c.bf16 %v91_v32, %v83_v30  ;;  %v637_v34 = vld [vmem:[#allocation2 + $0x40] sm:$0xff] }
 0x117   :  { %690 = vst [vmem:[#allocation2 + $0x18] sm:$0xff] %v652_v31   ;;  %392 = vmatpush.bf16.msra.mxu1 %v637_v34 }
 0x118   :  { %689 = vst [vmem:[#allocation2] sm:$0xff] %v647_v33  }
 0x11a   :  { %623 = vmatmul.msk.bf16.vlgmr.msra.gmra.mxu1 %vm359_vm11, %v574_v35 }
 0x11b   :  { %v61_v37 = vpop.permute.xlu1 %60 }
 0x11c   :  { %v63_v39 = vsel %vm56_vm12, %v61_v37, 0.0 }
 0x11d   :  { %v642_v40 = vpack.c.bf16 %v71_v38, %v63_v39 }
 0x11e   :  { %v631_v41 = vld [vmem:[#allocation2 + $0x18] sm:$0xff] }
 0x11f   :  { %643 = vst [vmem:[#allocation2 + $0x30] sm:$0xff] %v642_v40   ;;  %371 = vmatpush.bf16.msra.mxu0 %v631_v41  ;;  %703 = vmatpush.bf16.msra.mxu2 %v631_v41  ;;  %v630_v42 = vld [vmem:[#allocation2] sm:$0xff] }
 0x120   :  { %v436_v41 = vld [vmem:[%s973_s2] sm:$0xff] }
 0x123   :  { %372 = vmatpush.bf16.msra.mxu0 %v630_v42  ;;  %704 = vmatpush.bf16.msra.mxu2 %v630_v42 }
 0x126   :  { %v629_v48 = vld [vmem:[#allocation2 + $0x30] sm:$0xff] }
 0x127   :  { %373 = vmatpush.bf16.msra.mxu0 %v629_v48  ;;  %705 = vmatpush.bf16.msra.mxu2 %v629_v48 }
 0x12a   :  { %374 = vmatmul.bf16.vlgmr.msra.gmra.mxu0 %v570_v49  ;;  %379 = vmatmul.bf16.vlgmr.msra.gmra.mxu2 %v578_v50 }
 0x12b   :  { %624 = vmatmul.msk.bf16.gmra.mxu1 %vm359_vm11, %v582_v51  ;;  %v438_v51 = vld [vmem:[%s973_s2 + $0x10] sm:$0xff] }
 0x197   :  { %v394_v52 = vpop.f32.mrf.mxu1 }
 0x19f   :  { %v396_v53 = vpop.f32.mrf.mxu1 }
 0x1a7   :  { %v375_v54 = vpop.f32.mrf.mxu0 }
 0x1a8   :  { %v395_v55 = vadd.f32 %v394_v52, %v375_v54  ;;  %v399_v56 = vpop.f32.mrf.mxu1 }
 0x1aa   :  { %404 = vadd.xlane.f32.xlu0 %v395_v55 }
 0x1ad   :  { %v380_v57 = vpop.f32.mrf.mxu2 }
 0x1ae   :  { %v400_v58 = vadd.f32 %v399_v56, %v380_v57 }
 0x1af   :  { %v377_v59 = vpop.f32.mrf.mxu0 }
 0x1b0   :  { %v397_v60 = vadd.f32 %v396_v53, %v377_v59  ;;  %408 = vadd.xlane.f32.xlu2 %v400_v58  ;;  %v401_v61 = vpop.f32.mrf.mxu1  ;;  %v513_v59 = vld [vmem:[%s974_s3 + $0x8] sm:$0xff] }
 0x1b2   :  { %406 = vadd.xlane.f32.xlu1 %v397_v60 }
 0x1b5   :  { %v382_v62 = vpop.f32.mrf.mxu2 }
 0x1b6   :  { %v402_v63 = vadd.f32 %v401_v61, %v382_v62 }
 0x1b8   :  { %410 = vadd.xlane.f32.xlu2 %v402_v63 }
 0x21d   :  { %v405_v0 = vpop.xlane.xlu0 %404 }
 0x21e   :  { %v412_v1 = vmul.f32 0.0078125, %v405_v0  ;;  %v439_v0 = vld [vmem:[%s973_s2 + $0x18] sm:$0xff] }
 0x220   :  { %v924_v3 = vsub.f32 %v395_v55, %v412_v1  ;;  %v437_v55 = vld [vmem:[%s973_s2 + $0x8] sm:$0xff]  ;;  %s795_s2 = smov [#allocation3]  }
 0x222   :  { %v420_v4 = vmul.f32 %v924_v3, %v924_v3 }
 0x223   :  { %v409_v5 = vpop.xlane.xlu2 %408 }
 0x224   :  { %v414_v6 = vmul.f32 0.0078125, %v409_v5  ;;  %424 = vadd.xlane.f32.xlu0 %v420_v4  ;;  %v514_v4 = vld [vmem:[%s974_s3 + $0x10] sm:$0xff] }
 0x225   :  { %v407_v7 = vpop.xlane.xlu1 %406 }
 0x226   :  { %v928_v8 = vsub.f32 %v400_v58, %v414_v6  ;;  %v413_v2 = vmul.f32 0.0078125, %v407_v7  ;;  %v515_v6 = vld [vmem:[%s974_s3 + $0x18] sm:$0xff]  ;;  %s552_s3 = sshll.u32 %s795_s2, 4  ;;  %s553_s3 = int_to_ptr.vmem [resolvable:$true] %s552_s3 }
 0x228   :  { %v930_v9 = vsub.f32 %v397_v60, %v413_v2  ;;  %v422_v10 = vmul.f32 %v928_v8, %v928_v8 }
 0x22a   :  { %428 = vadd.xlane.f32.xlu2 %v422_v10  ;;  %v421_v11 = vmul.f32 %v930_v9, %v930_v9 }
 0x22b   :  { %v411_v12 = vpop.xlane.xlu2 %410 }
 0x22c   :  { %v415_v14 = vmul.f32 0.0078125, %v411_v12  ;;  %426 = vadd.xlane.f32.xlu1 %v421_v11 }
 0x22e   :  { %v936_v15 = vsub.f32 %v402_v63, %v415_v14 }
 0x230   :  { %v423_v16 = vmul.f32 %v936_v15, %v936_v15 }
 0x232   :  { %430 = vadd.xlane.f32.xlu0 %v423_v16 }
 0x242   :  { %518 = vperm.xlu2 %738, %v512_v18  }
 0x297   :  { %v425_v19 = vpop.xlane.xlu0 %424 }
 0x298   :  { %v432_v20 = vmul.f32 0.0078125, %v425_v19 }
 0x29a   :  { %v440_v21 = vadd.f32 1e-05, %v432_v20 }
 0x29c   :  { %739 = vrsqrt.f32 %v440_v21  ;;  %vm450_vm14 = vweird.f32 %v440_v21 }
 0x29d   :  { %v429_v22 = vpop.xlane.xlu2 %428 }
 0x29e   :  { %v434_v23 = vmul.f32 0.0078125, %v429_v22 }
 0x29f   :  { %v427_v24 = vpop.xlane.xlu1 %426 }
 0x2a0   :  { %v442_v25 = vadd.f32 1e-05, %v434_v23  ;;  %v433_v26 = vmul.f32 0.0078125, %v427_v24 }
 0x2a2   :  { %v740_v27 = vpop.eup %739  ;;  %741 = vrsqrt.f32 %v442_v25  ;;  %v441_v28 = vadd.f32 1e-05, %v433_v26  ;;  %vm470_vm2 = vweird.f32 %v442_v25 }
 0x2a3   :  { %v445_v29 = vmul.f32 %v740_v27, %v440_v21  ;;  %vm451_vm13 = vweird.f32 %v740_v27 }
 0x2a4   :  { %743 = vrsqrt.f32 %v441_v28  ;;  %vm452_vm15 = vmor %vm450_vm14, %vm451_vm13  ;;  %vm460_vm5 = vweird.f32 %v441_v28 }
 0x2a5   :  { %v446_v30 = vmul.f32 %v740_v27, %v445_v29  ;;  %v431_v31 = vpop.xlane.xlu0 %430  ;;  %v519_v7 = vpop.permute.xlu2 %518 }
 0x2a6   :  { %v435_v32 = vmul.f32 0.0078125, %v431_v31 }
 0x2a7   :  { %v447_v33 = vmul.f32 0.5, %v446_v30 }
 0x2a8   :  { %v742_v34 = vpop.eup %741  ;;  %v443_v35 = vadd.f32 1e-05, %v435_v32 }
 0x2a9   :  { %v448_v36 = vsub.f32 1.5, %v447_v33  ;;  %v465_v37 = vmul.f32 %v742_v34, %v442_v25  ;;  %vm471_vm1 = vweird.f32 %v742_v34 }
 0x2aa   :  { %v744_v38 = vpop.eup %743  ;;  %745 = vrsqrt.f32 %v443_v35  ;;  %vm472_vm4 = vmor %vm470_vm2, %vm471_vm1  ;;  %vm480_vm8 = vweird.f32 %v443_v35 }
 0x2ab   :  { %v466_v39 = vmul.f32 %v742_v34, %v465_v37  ;;  %v455_v40 = vmul.f32 %v744_v38, %v441_v28  ;;  %v449_v42 = vmul.f32 %v740_v27, %v448_v36  ;;  %vm461_vm3 = vweird.f32 %v744_v38 }
 0x2ac   :  { %vm462_vm6 = vmor %vm460_vm5, %vm461_vm3 }
 0x2ad   :  { %v467_v43 = vmul.f32 0.5, %v466_v39  ;;  %v456_v13 = vmul.f32 %v744_v38, %v455_v40  ;;  %v453_v44 = vsel %vm452_vm15, %v740_v27, %v449_v42 }
 0x2ae   :  { %v484_v45 = vmul.f32 %v453_v44, %v436_v41 }
 0x2af   :  { %v468_v46 = vsub.f32 1.5, %v467_v43  ;;  %v457_v47 = vmul.f32 0.5, %v456_v13 }
 0x2b0   :  { %v746_v48 = vpop.eup %745  ;;  %490 = vperm.xlu1 %736, %v484_v45  }
 0x2b1   :  { %v458_v49 = vsub.f32 1.5, %v457_v47  ;;  %v475_v50 = vmul.f32 %v746_v48, %v443_v35  ;;  %v469_v52 = vmul.f32 %v742_v34, %v468_v46  ;;  %vm481_vm7 = vweird.f32 %v746_v48 }
 0x2b2   :  { %vm482_vm9 = vmor %vm480_vm8, %vm481_vm7 }
 0x2b3   :  { %v476_v53 = vmul.f32 %v746_v48, %v475_v50  ;;  %v473_v54 = vsel %vm472_vm4, %v742_v34, %v469_v52  ;;  %v459_v56 = vmul.f32 %v744_v38, %v458_v49 }
 0x2b4   :  { %v486_v57 = vmul.f32 %v473_v54, %v438_v51 }
 0x2b5   :  { %v477_v58 = vmul.f32 0.5, %v476_v53  ;;  %v463_v60 = vsel %vm462_vm6, %v744_v38, %v459_v56 }
 0x2b6   :  { %500 = vperm.xlu0 %737, %v486_v57   ;;  %v485_v61 = vmul.f32 %v463_v60, %v437_v55 }
 0x2b7   :  { %v478_v62 = vsub.f32 1.5, %v477_v58 }
 0x2b8   :  { %523 = vperm.xlu1 %736, %v513_v59   ;;  %495 = vperm.xlu2 %738, %v485_v61  }
 0x2b9   :  { %v479_v63 = vmul.f32 %v746_v48, %v478_v62 }
 0x2bb   :  { %v483_v1 = vsel %vm482_vm9, %v746_v48, %v479_v63 }
 0x2bc   :  { %v487_v5 = vmul.f32 %v483_v1, %v439_v0 }
 0x2c0   :  { %505 = vperm.xlu1 %736, %v487_v5   ;;  %528 = vperm.xlu2 %738, %v514_v4  }
 0x2c8   :  { %533 = vperm.xlu1 %736, %v515_v6  }
 0x312   :  { %v496_v2 = vpop.permute.xlu2 %495 }
 0x313   :  { %v509_v18 = vmul.f32 %v496_v2, %v930_v9 }
 0x31a   :  { %v529_v17 = vpop.permute.xlu2 %528 }
 0x322   :  { %v491_v10 = vpop.permute.xlu1 %490 }
 0x323   :  { %v508_v11 = vmul.f32 %v491_v10, %v924_v3 }
 0x325   :  { %v536_v12 = vadd.f32 %v519_v7, %v508_v11 }
 0x327   :  { %v540_v14 = vmax.f32 %v536_v12, 0.0 }
 0x328   :  { %v501_v16 = vpop.permute.xlu0 %500 }
 0x329   :  { %544 = vst [vmem:[#allocation3] sm:$0xff] %v540_v14  ;;  %v510_v19 = vmul.f32 %v501_v16, %v928_v8 }
 0x32a   :  { %v524_v20 = vpop.permute.xlu1 %523 }
 0x32b   :  { %v538_v21 = vadd.f32 %v529_v17, %v510_v19  ;;  %v537_v22 = vadd.f32 %v524_v20, %v509_v18 }
 0x32d   :  { %v542_v23 = vmax.f32 %v538_v21, 0.0  ;;  %v541_v24 = vmax.f32 %v537_v22, 0.0 }
 0x32f   :  { %546 = vst [vmem:[#allocation3 + $0x10] sm:$0xff] %v542_v23 }
 0x330   :  { %545 = vst [vmem:[#allocation3 + $0x8] sm:$0xff] %v541_v24 }
 0x332   :  { %v506_v25 = vpop.permute.xlu1 %505 }
 0x333   :  { %v511_v26 = vmul.f32 %v506_v25, %v936_v15 }
 0x33a   :  { %v534_v3 = vpop.permute.xlu1 %533 }
 0x33b   :  { %v539_v9 = vadd.f32 %v534_v3, %v511_v26 }
 0x33d   :  { %v543_v8 = vmax.f32 %v539_v9, 0.0 }
 0x33f   :  { %547 = vst [vmem:[#allocation3 + $0x18] sm:$0xff] %v543_v8 }
 0x340   :  { %560 = dma.vmem_to_hbm [thread:$0]  %s553_s3, 512, %s555_s16, [#allocation4], %s796_s17, %s796_s17, %s797_s18  }
 0x341   :  { %771 = dma.done.wait [#allocation4], 512  }
 0x342   :  { %772 = vsyncadd [#allocation4], 4294966784 }
 0x343   :  { %565 = vsyncpa [#allocation4], 1 }

</bundles_post_ra>
